<compile_context>
chip_gen: v6e
topology: v6e:2x2x1
jax: 0.10.0
libtpu: 0.0.40
codegen_flags: <defaults>
</compile_context>

<pallas_src>
import functools

import jax
import jax.numpy as jnp
from jax.experimental import pallas as pl
from jax.experimental.pallas import tpu as pltpu


@functools.cache
def _roll_sign() -> int:
    """Resolve pltpu.roll's rotate direction once with a tiny probe kernel.

    Returns s such that pltpu.roll(v, (s * d) % n, axis=-1)[i] == v[(i + d) % n],
    so the 3x3 tap shifts below never depend on the backend rotate convention.
    """
    def probe(x_ref, o_ref):
        o_ref[...] = pltpu.roll(x_ref[...], 1, axis=1)

    x = jnp.arange(8 * 128, dtype=jnp.float32).reshape(8, 128)
    out = pl.pallas_call(
        probe, out_shape=jax.ShapeDtypeStruct((8, 128), jnp.float32))(x)
    return -1 if bool(jnp.array_equal(out, jnp.roll(x, 1, axis=1))) else 1


def _inverted_residual_kernel(x_ref, w1_ref, b1_ref, wd_ref, b2_ref, w2_ref,
                              b3_ref, o_ref, *, H, W, roll_sign):
    C, HW = x_ref.shape
    bf = C // 2

    x = x_ref[...].astype(jnp.float32)          # (C, H*W), lane-dense
    x1 = x[:bf, :]                              # pass-through half (chunk 1)
    x2 = x[bf:, :]                              # branch2 input   (chunk 2)

    # Parameters: small VMEM matrices, read once per stage (hoisted).
    w1 = w1_ref[...]                            # (bf, bf)
    wd = wd_ref[...]                            # (bf, 9)  3x3 taps flattened
    w2 = w2_ref[...]                            # (bf, bf)

    def pointwise(w, src, bias):
        # 1x1 conv (+ folded BN bias) as a broadcast-sum over input channels.
        # TODO(synk): switch to jnp.dot on the MXU at real channel widths.
        acc = w[:, 0:1] * src[0:1, :]
        for ci in range(1, bf):
            acc = acc + w[:, ci:ci + 1] * src[ci:ci + 1, :]
        return acc + bias

    # ---- branch2 stage 1: 1x1 conv (no bias) + folded BN + ReLU ----
    y = jnp.maximum(pointwise(w1, x2, b1_ref[...]), 0.0)   # (bf, H*W)

    # ---- branch2 stage 2: depthwise 3x3, stride 1, padding 1 + folded BN ----
    # Each tap is a lane rotation of the flattened spatial axis (XLU) plus a
    # border mask; the VPU only does the 9 multiply-adds.
    lane = jax.lax.broadcasted_iota(jnp.int32, (1, HW), 1)
    row = lane // W
    col = lane % W

    z = jnp.zeros_like(y)
    for dh in (-1, 0, 1):
        if dh == -1:
            h_ok = row >= 1
        elif dh == 1:
            h_ok = row <= H - 2
        else:
            h_ok = None
        for dw in (-1, 0, 1):
            ok = h_ok
            if dw == -1:
                ok = (col >= 1) if ok is None else (ok & (col >= 1))
            elif dw == 1:
                ok = (col <= W - 2) if ok is None else (ok & (col <= W - 2))
            delta = dh * W + dw
            if delta == 0:
                tap = y
            else:
                tap = pltpu.roll(y, (roll_sign * delta) % HW, axis=1)
            if ok is not None:
                tap = jnp.where(ok, tap, 0.0)
            t = (dh + 1) * 3 + (dw + 1)
            z = z + wd[:, t:t + 1] * tap        # (bf,1) * (bf,H*W)
    z = z + b2_ref[...]

    # ---- branch2 stage 3: 1x1 conv (no bias) + folded BN + ReLU ----
    u = jnp.maximum(pointwise(w2, z, b3_ref[...]), 0.0)    # (bf, H*W)

    # ---- concat((x1, branch2(x2)), dim=1) + channel_shuffle(groups=2) ----
    # groups=2 shuffle interleaves: out[2i] = x1[i], out[2i+1] = branch2[i].
    # Assemble the whole (C, H*W) block and write it with a single wide store.
    rows = []
    for i in range(bf):
        rows.append(x1[i:i + 1, :])
        rows.append(u[i:i + 1, :])
    o_ref[...] = jnp.concatenate(rows, axis=0).astype(o_ref.dtype)


def inverted_residual(x, w1, b1, wd, b2, w2, b3):
    """InvertedResidual forward (stride=1), BatchNorm folded into scale/shift."""
    N, C, H, W = x.shape
    bf = C // 2
    HW = H * W

    # Lane-dense view: flattened spatial axis (H*W, multiple of 128) on lanes,
    # channels on sublanes.  The reshape is free (no data movement).
    x_flat = x.reshape(N, C, HW)

    kernel = functools.partial(
        _inverted_residual_kernel, H=H, W=W, roll_sign=_roll_sign())

    out_flat = pl.pallas_call(
        kernel,
        out_shape=jax.ShapeDtypeStruct((N, C, HW), x.dtype),
        grid=(N,),
        in_specs=[
            pl.BlockSpec((None, C, HW), lambda n: (n, 0, 0)),
            pl.BlockSpec((bf, bf), lambda n: (0, 0)),
            pl.BlockSpec((bf, 1), lambda n: (0, 0)),
            pl.BlockSpec((bf, 9), lambda n: (0, 0)),
            pl.BlockSpec((bf, 1), lambda n: (0, 0)),
            pl.BlockSpec((bf, bf), lambda n: (0, 0)),
            pl.BlockSpec((bf, 1), lambda n: (0, 0)),
        ],
        out_specs=pl.BlockSpec((None, C, HW), lambda n: (n, 0, 0)),
        compiler_params=pltpu.CompilerParams(
            dimension_semantics=("parallel",)),
    )(x_flat, w1, b1.reshape(bf, 1), wd.reshape(bf, 9), b2.reshape(bf, 1),
      w2, b3.reshape(bf, 1))

    return out_flat.reshape(N, C, H, W)


def ref_forward(x, w1, b1, wd, b2, w2, b3):
    """Pure-JAX reference of the PyTorch forward (stride=1, BN folded)."""
    N, C, H, W = x.shape
    bf = C // 2
    hp = jax.lax.Precision.HIGHEST
    x1, x2 = x[:, :bf], x[:, bf:]
    y = jnp.einsum('oi,nihw->nohw', w1, x2, precision=hp) + b1[None, :, None, None]
    y = jnp.maximum(y, 0.0)
    yp = jnp.pad(y, ((0, 0), (0, 0), (1, 1), (1, 1)))
    z = jnp.zeros_like(y)
    for kh in range(3):
        for kw in range(3):
            z = z + wd[:, kh, kw][None, :, None, None] * yp[:, :, kh:kh + H, kw:kw + W]
    z = z + b2[None, :, None, None]
    u = jnp.einsum('oi,nihw->nohw', w2, z, precision=hp) + b3[None, :, None, None]
    u = jnp.maximum(u, 0.0)
    out = jnp.concatenate([x1, u], axis=1)
    out = out.reshape(N, 2, bf, H, W).transpose(0, 2, 1, 3, 4).reshape(N, 2 * bf, H, W)
    return out


if __name__ == "__main__":
    key = jax.random.PRNGKey(0)
    ks = jax.random.split(key, 8)

    # InvertedResidual(inp=4, oup=4, stride=1): requires inp == 2 * (oup // 2).
    N, C, H, W = 2, 4, 16, 16
    bf = C // 2

    x = jax.random.normal(ks[0], (N, C, H, W), jnp.float32)

    def bn_fold(k):
        k1, k2, k3, k4 = jax.random.split(k, 4)
        gamma = jax.random.uniform(k1, (bf,), jnp.float32, 0.5, 1.5)
        beta = 0.1 * jax.random.normal(k2, (bf,), jnp.float32)
        mean = 0.1 * jax.random.normal(k3, (bf,), jnp.float32)
        var = jax.random.uniform(k4, (bf,), jnp.float32, 0.5, 1.5)
        scale = gamma / jnp.sqrt(var + 1e-5)
        shift = beta - mean * scale
        return scale, shift

    # Deterministic synthetic parameters (shapes from the module __init__).
    w1_raw = 0.5 * jax.random.normal(ks[1], (bf, bf), jnp.float32)      # 1x1 conv
    wd_raw = 0.5 * jax.random.normal(ks[2], (bf, 3, 3), jnp.float32)    # depthwise 3x3
    w2_raw = 0.5 * jax.random.normal(ks[3], (bf, bf), jnp.float32)      # 1x1 conv
    s1, t1 = bn_fold(ks[4])
    s2, t2 = bn_fold(ks[5])
    s3, t3 = bn_fold(ks[6])

    # Fold each BatchNorm (inference mode) into the preceding conv + bias.
    w1 = s1[:, None] * w1_raw
    b1 = t1
    wd = s2[:, None, None] * wd_raw
    b2 = t2
    w2 = s3[:, None] * w2_raw
    b3 = t3

    out = inverted_residual(x, w1, b1, wd, b2, w2, b3)
    out = jax.block_until_ready(out)

    ref = ref_forward(x, w1, b1, wd, b2, w2, b3)
    assert out.shape == (N, C, H, W)
    assert jnp.allclose(out, ref, atol=1e-4, rtol=1e-4), float(jnp.max(jnp.abs(out - ref)))

    print("KERNEL_OK")
</pallas_src>

<mosaic_0001>
module attributes {stable_mosaic.version = 11 : i64} {
  func.func @probe(%arg0: memref<8x128xf32, #tpu.memory_space<vmem>>, %arg1: memref<8x128xf32, #tpu.memory_space<vmem>>) attributes {dimension_semantics = [], scalar_prefetch = 0 : i64, scratch_operands = 0 : i64, tpu.core_type = #tpu.core_type<tc>} {
    %c0 = arith.constant 0 : index
    %c0_0 = arith.constant 0 : index
    %0 = vector.load %arg0[%c0, %c0_0] : memref<8x128xf32, #tpu.memory_space<vmem>>, vector<8x128xf32>
    %c1_i32 = arith.constant 1 : i32
    %1 = tpu.dynamic_rotate %0 by %c1_i32 dim 1 : vector<8x128xf32>, i32 -> vector<8x128xf32>
    %c0_1 = arith.constant 0 : index
    %c0_2 = arith.constant 0 : index
    %2 = vector.load %arg1[%c0_1, %c0_2] : memref<8x128xf32, #tpu.memory_space<vmem>>, vector<8x128xf32>
    tpu.vector_store %arg1[%c0_1, %c0_2], %1 {strides = array<i32>} : memref<8x128xf32, #tpu.memory_space<vmem>>, vector<8x128xf32>,
    return
  }
}

</mosaic_0001>

<bundles_post_ra>
// kernel: tpu_custom_call.1
= control target key start
LH: loop header
LB: loop body
LE: loop exit
PB: predicated region body
PF: predicated region fallthrough
CT: control target
= control target key end

     0   :  { %6 = vsyncpa [#allocation3], 0  ;;  %s106_s0 = inlined_call_operand.hbm [shape: f32[8,128], index: 0, kind: input, shape index: {}]   ;;  %s107_s1 = inlined_call_operand.hbm [shape: f32[8,128], index: 1, kind: output, shape index: {}]  }
   0x1   :  { %7 = vsyncpa [#allocation4], 0  ;;  %s87_s6 = smov [#allocation2]  }
   0x2   :  { %s14_s7 = sshll.u32 %s87_s6, 4  ;;  %s15_s7 = int_to_ptr.vmem [resolvable:$true] %s14_s7 }
   0x3   :  { %s51_s8 = scalar_lea.vmem %s15_s7, 128  ;;  %p56_p1 = scmp.lt.s32.totalorder %s15_s7, %s15_s7 }
   0x4   :  { %p52_p0 = scmp.ne.s32.totalorder %s15_s7, %s51_s8  ;;  %p57_p2 = scmp.lt.s32.totalorder %s51_s8, %s51_s8 }
   0x6   :  { %p58_p3 = por %p57_p2, %p56_p1 }
   0x8   :  { %p59_p4 = pnand %p58_p3, %p52_p0 }
   0xa   :  { %62 = shalt.err (!%p59_p4)
}
   0xb   :  { %17 = dma.hbm_to_vmem [thread:$0]  %s106_s0, 128, %s15_s7, [#allocation3]  }
   0xc   :  { %83 = dma.done.wait [#allocation3], 128  }
   0xd   :  { %84 = vsyncadd [#allocation3], 4294967168  ;;  %v21_v0 = vld [vmem:[#allocation2] sm:$0xff]  ;;  %s88_s11 = smov 1   ;;  %s89_s12 = smov [#allocation5]  }
   0xe   :  { %22 = vrot.lane.b32.xlu0 %v21_v0, %s88_s11  ;;  %s31_s13 = sshll.u32 %s89_s12, 4  ;;  %s32_s13 = int_to_ptr.vmem [resolvable:$true] %s31_s13 }
   0xf   :  { %s63_s14 = scalar_lea.vmem %s32_s13, 128  ;;  %p68_p6 = scmp.lt.s32.totalorder %s32_s13, %s32_s13 }
  0x10   :  { %p64_p5 = scmp.ne.s32.totalorder %s32_s13, %s63_s14  ;;  %p69_p7 = scmp.lt.s32.totalorder %s63_s14, %s63_s14 }
  0x12   :  { %p70_p8 = por %p69_p7, %p68_p6 }
  0x14   :  { %p71_p9 = pnand %p70_p8, %p64_p5 }
  0x80   :  { %v23_v1 = vpop.permute.xlu0 %22 }
  0x81   :  { %24 = vst [vmem:[#allocation5] sm:$0xff] %v23_v1 }
  0x82   :  { %74 = shalt.err (!%p71_p9)
}
  0x83   :  { %34 = dma.vmem_to_hbm [thread:$0]  %s32_s13, 128, %s107_s1, [#allocation4]  }
  0x84   :  { %85 = dma.done.wait [#allocation4], 128  }
  0x85   :  { %86 = vsyncadd [#allocation4], 4294967168 }
  0x86   :  { %38 = vsyncpa [#allocation3], 1 }
  0x87   :  { %39 = vsyncpa [#allocation4], 1 }

</bundles_post_ra>
